<compile_context>
chip_gen: v7x
topology: tpu7x:2x2x1
jax: 0.10.0
libtpu: 0.0.40
codegen_flags: <defaults>
</compile_context>

<pallas_src>
import functools

import jax
import jax.numpy as jnp
from jax.experimental import pallas as pl
from jax.experimental.pallas import tpu as pltpu

_INV_255 = 1.0 / 255.0


# ----------------------------------------------------------------------------
# Tiling helper: largest row tile that divides n_rows, is a multiple of 8
# (unless it is the full extent) and keeps one f32 block under target_bytes.
# ----------------------------------------------------------------------------
def _choose_row_tile(n_rows, row_bytes, target_bytes):
    if n_rows * row_bytes <= target_bytes:
        return n_rows
    best = None
    for r in range(8, n_rows, 8):
        if n_rows % r == 0 and r * row_bytes <= target_bytes:
            best = r
    return best if best is not None else n_rows


# ----------------------------------------------------------------------------
# Kernel 1 (standalone, API parity): byte image -> log image
# ----------------------------------------------------------------------------
def _log_image_kernel(img_ref, out_ref, *, eps):
    out_ref[...] = jnp.log(img_ref[...] * _INV_255 + eps)


def log_images(u8_images, eps=1e-7):
    """u8_images: (B, T, H, W) float32 values in [0, 255]."""
    B, T, H, W = u8_images.shape
    flat = u8_images.astype(jnp.float32).reshape(B * T, H * W)   # lane-dense last dim
    N, L = flat.shape
    rows = _choose_row_tile(N, L * 4, 4 << 20)
    out = pl.pallas_call(
        functools.partial(_log_image_kernel, eps=eps),
        out_shape=jax.ShapeDtypeStruct((N, L), jnp.float32),
        grid_spec=pltpu.PrefetchScalarGridSpec(
            num_scalar_prefetch=0,
            grid=(N // rows,),
            in_specs=[pl.BlockSpec((rows, L), lambda i: (i, 0))],
            out_specs=pl.BlockSpec((rows, L), lambda i: (i, 0)),
        ),
        compiler_params=pltpu.CompilerParams(
            dimension_semantics=("parallel",),
            vmem_limit_bytes=48 * 1024 * 1024),
    )(flat)
    return out.reshape(B, T, H, W)


# ----------------------------------------------------------------------------
# Kernel 2: fused log + event counting (GPUEventSimulator.count_events hot path)
# ----------------------------------------------------------------------------
def _count_events_kernel(
    # SMEM scalar tables
    image_ts_ref,        # (B*T,) f32, microseconds (flattened, index b*T + t)
    first_times_ref,     # (B,)   f32 flags
    prev_image_ts_ref,   # (B,)   f32
    refractory_ref,      # (B,)   f32
    leak_ref,            # (B,)   f32   (leak_rate_hz * 1e-6)
    th_mu_ref,           # (B,)   f32
    # VMEM tiles
    video_ref,           # (1, 1, TH, W) raw byte frame (as f32)
    thresholds_ref,      # (2, 1, TH, W) [cp; cm]
    log_states_in_ref,   # (1, TH, W) carried reference voltage
    prev_log_in_ref,     # (1, TH, W) carried previous log image
    timestamps_in_ref,   # (1, TH, W) carried last-event timestamps
    # outputs (resident across the T grid axis)
    counts_ref,          # (1, TH, W) int32
    log_states_ref,      # (1, TH, W) f32
    timestamps_ref,      # (1, TH, W) f32
    # VMEM scratch (persists across grid steps, re-initialized at t == 0)
    inv_thr_ref,         # (2, TH, W) f32 hoisted 1/thresholds
    prev_img_ref,        # (TH, W)    f32 previous frame's log image
    *, T, eps,
):
    b = pl.program_id(0)
    t = pl.program_id(2)

    ftv = (first_times_ref[b] > 0.0).astype(jnp.float32)     # 1.0 if new video
    refrac = refractory_ref[b]
    ts = image_ts_ref[b * T + t]
    start_ts = ftv * image_ts_ref[b * T] + (1.0 - ftv) * prev_image_ts_ref[b]

    # fused log conversion of the raw frame (1 byte/elem of HBM traffic)
    img = jnp.log(video_ref[0, 0] * _INV_255 + eps)           # (TH, W)

    @pl.when(t == 0)
    def _init():
        counts_ref[...] = jnp.zeros_like(counts_ref)
        log_states_ref[0] = ftv * img + (1.0 - ftv) * log_states_in_ref[0]
        prev_img_ref[...] = ftv * img + (1.0 - ftv) * prev_log_in_ref[0]
        timestamps_ref[0] = (ftv * (start_ts - refrac - 1.0)
                             + (1.0 - ftv) * timestamps_in_ref[0])
        # hoist the per-pixel divide out of the T loop (one divide per block)
        inv_thr_ref[...] = 1.0 / thresholds_ref[:, 0]

    prev_idx = b * T + jnp.maximum(t - 1, 0)
    prev_ts = jnp.where(t == 0, start_ts, image_ts_ref[prev_idx])
    dt = ts - prev_ts

    cp = thresholds_ref[0, 0]          # positive contrast threshold (TH, W)
    cm = thresholds_ref[1, 0]          # negative contrast threshold (TH, W)
    inv_cp = inv_thr_ref[0]
    inv_cm = inv_thr_ref[1]

    prev_img = prev_img_ref[...]
    last_ev_ts = timestamps_ref[0]

    # reference-voltage leakage (leak_rate_hz defaults to 0 in the module)
    ref_v = log_states_ref[0] - leak_ref[b] * dt * th_mu_ref[b]

    diff = img - ref_v
    pos = diff >= 0.0
    amp = jnp.where(pos, cp, cm)
    inv_amp = jnp.where(pos, inv_cp, inv_cm)
    sgn = jnp.where(pos, 1.0, -1.0)
    n_cross = jnp.floor(jnp.abs(diff) * inv_amp)      # number of threshold crossings

    # Refractory gating (vectorized approximation of the per-event loop):
    # suppress this frame's events if the last emitted event is still within
    # the refractory window of the current frame timestamp.
    # TODO(synk): exact per-interpolated-event refractory filtering and shot-noise
    #             events require a data-dependent inner loop; approximated here.
    allowed = (ts - last_ev_ts) > refrac
    n_emit = jnp.where(allowed, n_cross, 0.0)

    # Interpolated timestamp of the last crossing within [prev_ts, ts].
    last_level = ref_v + sgn * n_cross * amp
    denom = img - prev_img
    safe = jnp.abs(denom) > 1e-9
    recip_denom = pl.reciprocal(jnp.where(safe, denom, 1.0), approx=True)
    frac = jnp.where(safe, (last_level - prev_img) * recip_denom, 1.0)
    frac = jnp.clip(frac, 0.0, 1.0)
    ev_ts = prev_ts + dt * frac

    counts_ref[...] = counts_ref[...] + n_emit[None].astype(jnp.int32)
    log_states_ref[0] = last_level
    timestamps_ref[0] = jnp.where(n_emit > 0.0, ev_ts, last_ev_ts)
    prev_img_ref[...] = img


def count_events(raw_video, image_ts, first_times, prev_image_ts, thresholds,
                 log_states, prev_log_images, timestamps,
                 refractory_periods, leak_rates, threshold_mus, eps=1e-7):
    """raw_video: (B, T, H, W) f32 byte values in [0,255].  Log is computed in-kernel."""
    B, T, H, W = raw_video.shape
    TH = _choose_row_tile(H, W * 4, 1 << 20)       # H-tile; divides H, mult of 8 or full
    n_h = H // TH

    smem = pl.BlockSpec(memory_space=pltpu.MemorySpace.SMEM)
    state_in_spec = pl.BlockSpec((1, TH, W), lambda b, h, t: (b, h, 0))
    state_out_spec = pl.BlockSpec((1, TH, W), lambda b, h, t: (b, h, 0))

    out_shape = (
        jax.ShapeDtypeStruct((B, H, W), jnp.int32),    # counts
        jax.ShapeDtypeStruct((B, H, W), jnp.float32),  # new log_states
        jax.ShapeDtypeStruct((B, H, W), jnp.float32),  # new timestamps
    )

    return pl.pallas_call(
        functools.partial(_count_events_kernel, T=T, eps=eps),
        out_shape=out_shape,
        grid_spec=pltpu.PrefetchScalarGridSpec(
            num_scalar_prefetch=0,
            grid=(B, n_h, T),
            in_specs=[
                smem,  # image_ts flat  (B*T,)
                smem,  # first_times    (B,)
                smem,  # prev_image_ts  (B,)
                smem,  # refractory     (B,)
                smem,  # leak           (B,)
                smem,  # threshold_mu   (B,)
                pl.BlockSpec((1, 1, TH, W), lambda b, h, t: (b, t, h, 0)),  # raw video
                pl.BlockSpec((2, 1, TH, W), lambda b, h, t: (0, b, h, 0)),  # thresholds
                state_in_spec,  # log_states in
                state_in_spec,  # prev_log_images in
                state_in_spec,  # timestamps in
            ],
            out_specs=(state_out_spec, state_out_spec, state_out_spec),
            scratch_shapes=[
                pltpu.VMEM((2, TH, W), jnp.float32),   # hoisted 1/thresholds
                pltpu.VMEM((TH, W), jnp.float32),      # previous log frame
            ],
        ),
        compiler_params=pltpu.CompilerParams(
            dimension_semantics=("parallel", "parallel", "arbitrary"),
            vmem_limit_bytes=48 * 1024 * 1024),
    )(image_ts.reshape(-1).astype(jnp.float32), first_times, prev_image_ts,
      refractory_periods, leak_rates, threshold_mus,
      raw_video, thresholds, log_states, prev_log_images, timestamps)


# ----------------------------------------------------------------------------
# Thin stateful wrapper mirroring the nn.Module's buffers / API
# ----------------------------------------------------------------------------
class GPUEventSimulatorPallas:
    def __init__(self, key, batch_size, height, width, c_mu=0.1, c_std=0.022,
                 refractory_period=10, leak_rate_hz=0.0, cutoff_hz=0.0,
                 shot_noise_hz=0.0):
        B, H, W = batch_size, height, width
        self.log_states = jnp.zeros((B, H, W), jnp.float32)       # torch: float64
        self.prev_log_images = jnp.zeros((B, H, W), jnp.float32)
        self.counts = jnp.zeros((B, H, W), jnp.int32)
        self.timestamps = jnp.zeros((B, H, W), jnp.float32)
        thr = jax.random.normal(key, (2, B, H, W), jnp.float32) * c_std + c_mu
        self.thresholds = jnp.clip(thr, 0.01, 1.0)
        self.prev_image_ts = jnp.zeros((B,), jnp.float32)
        self.refractory_periods = jnp.full((B,), float(refractory_period), jnp.float32)
        self.leak_rates = jnp.full((B,), leak_rate_hz * 1e-6, jnp.float32)
        self.shot_rates = jnp.full((B,), shot_noise_hz * 1e-6, jnp.float32)
        self.threshold_mus = jnp.full((B,), c_mu, jnp.float32)
        # TODO(synk): cutoff / dynamic_moving_average (photodiode latency IIR) and
        #             shot-noise RNG path not implemented (defaults are 0 anyway).

    def log_images(self, u8imgs, eps=1e-7):
        return log_images(u8imgs.astype(jnp.float32), eps=eps)

    def count_events(self, raw_video, image_ts, first_times, eps=1e-7):
        """raw_video: (B,T,H,W) byte values; log conversion is fused into the kernel."""
        raw_video = raw_video.astype(jnp.float32)
        counts, ls, tss = count_events(
            raw_video, image_ts, first_times, self.prev_image_ts,
            self.thresholds, self.log_states, self.prev_log_images,
            self.timestamps, self.refractory_periods, self.leak_rates,
            self.threshold_mus, eps=eps)
        self.counts = counts
        self.log_states = ls
        self.timestamps = tss
        # prev_log_images is simply the log of the last frame of each video;
        # recompute it here (one frame) instead of carrying a 4th output stream.
        self.prev_log_images = jnp.log(raw_video[:, -1] * _INV_255 + eps)
        self.prev_image_ts = image_ts[:, -1].astype(jnp.float32)
        return counts


if __name__ == "__main__":
    B, T, H, W = 2, 8, 16, 16
    key = jax.random.PRNGKey(0)
    k_thr, k_img = jax.random.split(key)

    sim = GPUEventSimulatorPallas(k_thr, B, H, W, c_mu=0.1, c_std=0.022,
                                  refractory_period=10)

    # deterministic synthetic byte video, (B, T, H, W) in [0, 255]
    u8_video = (jax.random.uniform(k_img, (B, T, H, W)) * 255.0).astype(jnp.float32)
    # frame timestamps in microseconds, 10 ms apart
    image_ts = (jnp.arange(T, dtype=jnp.float32)[None, :] * 10000.0
                + jnp.zeros((B, 1), jnp.float32))
    first_times = jnp.ones((B,), jnp.float32)   # every video just started

    # standalone log_images (API parity) + fused count_events (hot path)
    log_video = sim.log_images(u8_video)
    counts = sim.count_events(u8_video, image_ts, first_times)

    jax.block_until_ready(log_video)
    jax.block_until_ready(counts)
    jax.block_until_ready(sim.log_states)
    print("KERNEL_OK")
</pallas_src>

<mosaic_0001>
module attributes {stable_mosaic.version = 11 : i64} {
  func.func @_log_image_kernel(%arg0: i32, %arg1: memref<16x256xf32, #tpu.memory_space<vmem>>, %arg2: memref<16x256xf32, #tpu.memory_space<vmem>>) attributes {dimension_semantics = [#tpu.dimension_semantics<parallel>], iteration_bounds = array<i64: 1>, scalar_prefetch = 0 : i64, scratch_operands = 0 : i64, tpu.core_type = #tpu.core_type<tc>, window_params = [{transform_indices = @transform_0, window_bounds = array<i64: 16, 256>}, {transform_indices = @transform_1, window_bounds = array<i64: 16, 256>}]} {
    %c0 = arith.constant 0 : index
    %c0_0 = arith.constant 0 : index
    %0 = vector.load %arg1[%c0, %c0_0] : memref<16x256xf32, #tpu.memory_space<vmem>>, vector<16x256xf32>
    %cst = arith.constant 0.00392156886 : f32
    %1 = vector.broadcast %cst : f32 to vector<16x256xf32>
    %2 = arith.mulf %0, %1 : vector<16x256xf32>
    %cst_1 = arith.constant 1.000000e-07 : f32
    %3 = vector.broadcast %cst_1 : f32 to vector<16x256xf32>
    %4 = arith.addf %2, %3 : vector<16x256xf32>
    %5 = math.log %4 : vector<16x256xf32>
    %c0_2 = arith.constant 0 : index
    %c0_3 = arith.constant 0 : index
    %6 = vector.load %arg2[%c0_2, %c0_3] : memref<16x256xf32, #tpu.memory_space<vmem>>, vector<16x256xf32>
    tpu.vector_store %arg2[%c0_2, %c0_3], %5 {strides = array<i32>} : memref<16x256xf32, #tpu.memory_space<vmem>>, vector<16x256xf32>,
    return
  }
  func.func @transform_0(%arg0: i32) -> (i32, i32) {
    %c0_i32 = arith.constant 0 : i32
    %c0_i32_0 = arith.constant 0 : i32
    return %arg0, %c0_i32 : i32, i32
  }
  func.func @transform_1(%arg0: i32) -> (i32, i32) {
    %c0_i32 = arith.constant 0 : i32
    %c0_i32_0 = arith.constant 0 : i32
    return %arg0, %c0_i32 : i32, i32
  }
}

</mosaic_0001>

<bundles_post_ra>
// kernel: tpu_custom_call.1
= control target key start
LH: loop header
LB: loop body
LE: loop exit
PB: predicated region body
PF: predicated region fallthrough
CT: control target
= control target key end

     0   :  { %6 = vsyncpa [#allocation3], 0  ;;  %s168_s0 = inlined_call_operand.hbm [shape: f32[16,256], index: 0, kind: input, shape index: {}]   ;;  %s169_s1 = inlined_call_operand.hbm [shape: f32[16,256], index: 1, kind: output, shape index: {}]  }
   0x1   :  { %7 = vsyncpa [#allocation4], 0  ;;  %s124_s6 = smov [#allocation2]   ;;  %s76_s10 = scalar_lea.hbm %s168_s0, 512 }
   0x2   :  { %s13_s7 = sshll.u32 %s124_s6, 4  ;;  %p77_p0 = scmp.ne.s32.totalorder %s168_s0, %s76_s10  ;;  %s14_s7 = int_to_ptr.vmem [resolvable:$true] %s13_s7 }
   0x3   :  { %p80_p1 = scmp.lt.u32.totalorder %s76_s10, %s168_s0 }
   0x5   :  { %p82_p2 = pnand %p80_p1, %p77_p0 }
   0x7   :  { %85 = shalt.err (!%p82_p2)
}
   0x8   :  { %s86_s15 = scalar_lea.vmem %s14_s7, 512  ;;  %p91_p4 = scmp.lt.s32.totalorder %s14_s7, %s14_s7 }
   0x9   :  { %p87_p3 = scmp.ne.s32.totalorder %s14_s7, %s86_s15  ;;  %p92_p5 = scmp.lt.s32.totalorder %s86_s15, %s86_s15 }
   0xb   :  { %p93_p6 = por %p92_p5, %p91_p4 }
   0xd   :  { %p94_p7 = pnand %p93_p6, %p87_p3 }
   0xf   :  { %97 = shalt.err (!%p94_p7)
}
  0x10   :  { %s125_s16 = smov 256   ;;  %s126_s17 = smov 16  }
  0x11   :  { %19 = dma.hbm_to_vmem [thread:$0]  %s168_s0, 512, %s14_s7, [#allocation3], %s125_s16, %s125_s16, %s126_s17  }
  0x12   :  { %120 = dma.done.wait [#allocation3], 512  }
  0x13   :  { %121 = vsyncadd [#allocation3], 4294966784  ;;  %v23_v0 = vld [vmem:[#allocation2] sm:$0xff]  ;;  %v24_v1 = vld [vmem:[#allocation2 + $0x8] sm:$0xff]  ;;  %s127_s0 = smov [#allocation5]  }
  0x14   :  { %v25_v2 = vld [vmem:[#allocation2 + $0x10] sm:$0xff]  ;;  %v27_v3 = vmul.f32 0.003921569, %v23_v0  ;;  %v28_v4 = vmul.f32 0.003921569, %v24_v1  ;;  %v26_v6 = vld [vmem:[#allocation2 + $0x18] sm:$0xff] }
  0x15   :  { %v29_v5 = vmul.f32 0.003921569, %v25_v2  ;;  %v30_v10 = vmul.f32 0.003921569, %v26_v6  ;;  %s52_s20 = sshll.u32 %s127_s0, 4  ;;  %s53_s20 = int_to_ptr.vmem [resolvable:$true] %s52_s20 }
  0x16   :  { %v31_v7 = vadd.f32 1e-07, %v27_v3  ;;  %v32_v8 = vadd.f32 1e-07, %v28_v4  ;;  %s98_s21 = scalar_lea.vmem %s53_s20, 512  ;;  %p103_p9 = scmp.lt.s32.totalorder %s53_s20, %s53_s20 }
  0x17   :  { %v33_v9 = vadd.f32 1e-07, %v29_v5  ;;  %v34_v11 = vadd.f32 1e-07, %v30_v10  ;;  %p99_p8 = scmp.ne.s32.totalorder %s53_s20, %s98_s21  ;;  %p104_p10 = scmp.lt.s32.totalorder %s98_s21, %s98_s21 }
  0x18   :  { %68 = vlog2.f32 %v31_v7 }
  0x19   :  { %70 = vlog2.f32 %v32_v8  ;;  %p105_p11 = por %p104_p10, %p103_p9 }
  0x1a   :  { %72 = vlog2.f32 %v33_v9 }
  0x1b   :  { %74 = vlog2.f32 %v34_v11  ;;  %p106_p12 = pnand %p105_p11, %p99_p8 }
  0x22   :  { %v69_v12 = vpop.eup %68 }
  0x23   :  { %v71_v13 = vpop.eup %70  ;;  %v36_v14 = vmul.f32 0.6931472, %v69_v12 }
  0x24   :  { %v73_v15 = vpop.eup %72  ;;  %v38_v16 = vmul.f32 0.6931472, %v71_v13 }
  0x25   :  { %v75_v17 = vpop.eup %74  ;;  %43 = vst [vmem:[#allocation5] sm:$0xff] %v36_v14  ;;  %v40_v18 = vmul.f32 0.6931472, %v73_v15 }
  0x26   :  { %44 = vst [vmem:[#allocation5 + $0x8] sm:$0xff] %v38_v16  ;;  %v42_v19 = vmul.f32 0.6931472, %v75_v17 }
  0x27   :  { %45 = vst [vmem:[#allocation5 + $0x10] sm:$0xff] %v40_v18 }
  0x28   :  { %46 = vst [vmem:[#allocation5 + $0x18] sm:$0xff] %v42_v19 }
  0x29   :  { %109 = shalt.err (!%p106_p12)
}
  0x2a   :  { %s110_s24 = scalar_lea.hbm %s169_s1, 512 }
  0x2b   :  { %p111_p13 = scmp.ne.s32.totalorder %s169_s1, %s110_s24  ;;  %p114_p0 = scmp.lt.u32.totalorder %s110_s24, %s169_s1 }
  0x2d   :  { %p116_p1 = pnand %p114_p0, %p111_p13 }
  0x2f   :  { %119 = shalt.err (!%p116_p1)
}
  0x30   :  { %58 = dma.vmem_to_hbm [thread:$0]  %s53_s20, 512, %s169_s1, [#allocation4], %s125_s16, %s125_s16, %s126_s17  }
  0x31   :  { %122 = dma.done.wait [#allocation4], 512  }
  0x32   :  { %123 = vsyncadd [#allocation4], 4294966784 }
  0x33   :  { %62 = vsyncpa [#allocation3], 1 }
  0x34   :  { %63 = vsyncpa [#allocation4], 1 }

</bundles_post_ra>
